<compile_context>
chip_gen: v7x
topology: tpu7x:2x2x1
jax: 0.10.0
libtpu: 0.0.40
codegen_flags: <defaults>
</compile_context>

<pallas_src>
import functools
import numpy as np
import jax
import jax.numpy as jnp
from jax.experimental import pallas as pl
from jax.experimental.pallas import tpu as pltpu


# ----------------------------------------------------------------------------
# Positional encoding table (exact port of position_encoding_init)
# ----------------------------------------------------------------------------
def position_encoding_init(n_position, d_pos_vec):
    position_enc = np.array(
        [
            [pos / np.power(10000, 2 * (j // 2) / d_pos_vec) for j in range(d_pos_vec)]
            if pos != 0
            else np.zeros(d_pos_vec)
            for pos in range(n_position)
        ]
    )
    position_enc[1:, 0::2] = np.sin(position_enc[1:, 0::2])
    position_enc[1:, 1::2] = np.cos(position_enc[1:, 1::2])
    return jnp.asarray(position_enc, dtype=jnp.float32)


# ----------------------------------------------------------------------------
# Pallas kernel: in-kernel splice (5 shifted matmuls) -> +bias -> ReLU -> +pos
# ----------------------------------------------------------------------------
def encoder_kernel(x_ref, w_ref, b_ref, pos_ref, out_ref, *, shifts, halo):
    # x_ref:   (T_ctx, F)       whole ctx-padded sequence for this batch
    #                            (batch dim squeezed; block keyed on b only,
    #                             so it stays resident across inner t steps)
    # w_ref:   (K, F, d_pad)    fused weight, one (F, d_pad) slab per offset
    # b_ref:   (1, d_pad)       TDNN bias
    # pos_ref: (T_pad, d_pad)   FULL positional table (constant block, 1 DMA)
    # out_ref: (t_tile, d_pad)  output tile for this (batch, time-tile)
    t_tile, d_pad = out_ref.shape
    row0 = pl.multiple_of(pl.program_id(1) * t_tile, 8)

    # Haloed window of the padded input for this time tile.
    win = x_ref[pl.ds(row0, t_tile + halo), :]

    # Frame splicing as a sum of shifted matmuls (f32 accumulation on MXU).
    acc = jnp.zeros((t_tile, d_pad), jnp.float32)
    for k, s in enumerate(shifts):
        acc += jnp.dot(
            win[s:s + t_tile, :], w_ref[k], preferred_element_type=jnp.float32
        )

    h = jnp.maximum(acc + b_ref[...], 0.0)            # TDNN bias + ReLU (f32)
    h = h + pos_ref[pl.ds(row0, t_tile), :]           # + positional encoding (f32)
    out_ref[...] = h.astype(out_ref.dtype)            # cast only at the store


def encoder_test_forward(
    src_seq,
    params,
    *,
    row_tile=512,
    compute_dtype=jnp.bfloat16,   # bf16 MXU path is native on v5e/v6e/v7x
    out_dtype=jnp.float32,
):
    """src_seq: (B, T, F) float32. Returns (B, T, d_model) in out_dtype."""
    B, T, F = src_seq.shape
    offsets = tuple(params["concat_offsets"])
    K = len(offsets)
    d_model = params["proj_w"].shape[0]
    D5 = F * K

    pos_table = params["pos_table"]                   # (max_len, d_model)
    assert pos_table.shape[0] >= T, "encoder_max_len must be >= sequence length"

    ctx = max(abs(o) for o in offsets)
    halo = 2 * ctx
    halo_pad = ((halo + 7) // 8) * 8                  # sublane-friendly window halo
    shifts = tuple(o + ctx for o in offsets)          # window-relative row shifts

    # --- Fuse the three linear layers (no nonlinearity between them).
    # Re-associates the f32 matmuls -> ~1e-5-level difference vs. unfused.
    w_fused = params["lda_mat"].T @ params["proj_w"].T @ params["tdnn_w"].T  # (D5, d_model)

    # --- Lane-dense padding of the model dim; reshape per splice offset.
    d_pad = ((d_model + 127) // 128) * 128
    w_fused = jnp.pad(w_fused, ((0, 0), (0, d_pad - d_model)))
    w_fused = w_fused.reshape(K, F, d_pad).astype(compute_dtype)
    bias_p = jnp.pad(params["tdnn_b"], (0, d_pad - d_model)).reshape(1, d_pad)
    bias_p = bias_p.astype(jnp.float32)

    # --- Time tiling (multiple of 8 sublanes, capped by requested row_tile).
    t_tile = min(row_tile, ((T + 7) // 8) * 8)
    t_tile = ((t_tile + 7) // 8) * 8
    n_t = (T + t_tile - 1) // t_tile
    T_pad = n_t * t_tile

    # --- Zero-pad the RAW input (ConcatLayer edge policy): ctx halo on the
    # left, halo + tail padding on the right.  No 5x spliced tensor anymore.
    x = jnp.pad(src_seq, ((0, 0), (ctx, (T_pad - T) + (halo_pad - ctx)), (0, 0)))
    x = x.astype(compute_dtype)
    T_ctx = T_pad + halo_pad
    # Note: F is deliberately left unpadded (block == full array dim); padding
    # it to 128 lanes would only inflate input HBM bytes in a mem-bound kernel.

    # --- Full positional table (constant block -> DMA'd exactly once), f32.
    pos = jnp.pad(pos_table[:T], ((0, T_pad - T), (0, d_pad - d_model)))
    pos = pos.astype(jnp.float32)                     # (T_pad, d_pad)

    # batch OUTER, time-tile INNER: x block (keyed on b) is not re-DMA'd across
    # inner steps; w / bias / pos have constant index maps -> fetched once.
    grid = (B, n_t)

    in_item = jnp.dtype(compute_dtype).itemsize
    out_item = jnp.dtype(out_dtype).itemsize
    cost = pl.CostEstimate(
        flops=2 * B * T_pad * D5 * d_pad,
        transcendentals=0,
        bytes_accessed=(B * T_ctx * F * in_item       # raw padded input (once per batch)
                        + K * F * d_pad * in_item     # fused weight (once)
                        + d_pad * 4                   # bias (once)
                        + T_pad * d_pad * 4           # pos table (once)
                        + B * T_pad * d_pad * out_item),  # output
    )

    kern = functools.partial(encoder_kernel, shifts=shifts, halo=halo_pad)
    out = pl.pallas_call(
        kern,
        out_shape=jax.ShapeDtypeStruct((B, T_pad, d_pad), out_dtype),
        grid=grid,
        in_specs=[
            pl.BlockSpec((None, T_ctx, F), lambda b, t: (b, 0, 0)),   # padded input (per batch)
            pl.BlockSpec((K, F, d_pad), lambda b, t: (0, 0, 0)),      # fused weight (constant)
            pl.BlockSpec((1, d_pad), lambda b, t: (0, 0)),            # TDNN bias (constant)
            pl.BlockSpec((T_pad, d_pad), lambda b, t: (0, 0)),        # full pos table (constant)
        ],
        out_specs=pl.BlockSpec((None, t_tile, d_pad), lambda b, t: (b, t, 0)),
        compiler_params=pltpu.CompilerParams(
            dimension_semantics=("parallel", "parallel")),
        cost_estimate=cost,
    )(x, w_fused, bias_p, pos)

    if T_pad == T and d_pad == d_model:
        return out                                    # no extra slice pass over HBM
    return out[:, :T, :d_model]


# ----------------------------------------------------------------------------
# Pure-JAX reference (same math, unfused, f32) for a sanity check
# ----------------------------------------------------------------------------
def reference_forward(src_seq, params):
    B, T, F = src_seq.shape
    offsets = params["concat_offsets"]
    ctx = max(abs(o) for o in offsets)
    padded = jnp.pad(src_seq, ((0, 0), (ctx, ctx), (0, 0)))
    spliced = jnp.concatenate(
        [padded[:, ctx + off : ctx + off + T, :] for off in offsets], axis=-1
    )
    h = spliced @ params["lda_mat"].T
    h = h @ params["proj_w"].T
    h = jnp.maximum(h @ params["tdnn_w"].T + params["tdnn_b"], 0.0)
    return h + params["pos_table"][:T][None, :, :]


if __name__ == "__main__":
    # Small shapes consistent with the module
    B, T = 2, 8
    n_src_dim = 8
    d_model = 32
    encoder_max_len = 16
    concat_offsets = [-2, -1, 0, 1, 2]
    D5 = n_src_dim * len(concat_offsets)

    key = jax.random.PRNGKey(0)
    k_x, k_lda, k_proj, k_tw, k_tb = jax.random.split(key, 5)

    params = {
        "concat_offsets": concat_offsets,
        "pos_table": position_encoding_init(encoder_max_len, d_model),
        "lda_mat": jax.random.normal(k_lda, (D5, D5), jnp.float32) * 0.1,
        "proj_w": jax.random.normal(k_proj, (d_model, D5), jnp.float32) * 0.1,
        "tdnn_w": jax.random.normal(k_tw, (d_model, d_model), jnp.float32) * 0.1,
        "tdnn_b": jax.random.normal(k_tb, (d_model,), jnp.float32) * 0.01,
    }

    src_seq = jax.random.normal(k_x, (B, T, n_src_dim), jnp.float32)
    # src_pad_mask is unused in the eval-mode forward (dropout is identity)

    ref = reference_forward(src_seq, params)

    # f32 compute path (exact up to matmul re-association from the weight fusion)
    out = encoder_test_forward(
        src_seq, params, compute_dtype=jnp.float32, out_dtype=jnp.float32
    )
    out = jax.block_until_ready(out)
    assert out.shape == (B, T, d_model)
    np.testing.assert_allclose(np.asarray(out), np.asarray(ref), rtol=1e-4, atol=1e-4)

    # bf16 compute, f32 output (default MXU path on v5e/v6e/v7x)
    out_bf = encoder_test_forward(
        src_seq, params, compute_dtype=jnp.bfloat16, out_dtype=jnp.float32
    )
    out_bf = jax.block_until_ready(out_bf)
    np.testing.assert_allclose(np.asarray(out_bf), np.asarray(ref), rtol=5e-2, atol=5e-2)

    # bf16 compute + bf16 output (lowest HBM traffic, if consumer tolerates bf16)
    out_bf16 = encoder_test_forward(
        src_seq, params, compute_dtype=jnp.bfloat16, out_dtype=jnp.bfloat16
    )
    out_bf16 = jax.block_until_ready(out_bf16)
    np.testing.assert_allclose(
        np.asarray(out_bf16, dtype=np.float32), np.asarray(ref), rtol=5e-2, atol=5e-2
    )

    print("KERNEL_OK")
</pallas_src>

<mosaic_0001>
module attributes {stable_mosaic.version = 11 : i64} {
  func.func @encoder_kernel(%arg0: i32, %arg1: i32, %arg2: memref<1x16x8xf32, #tpu.memory_space<vmem>>, %arg3: memref<5x8x128xf32, #tpu.memory_space<vmem>>, %arg4: memref<1x128xf32, #tpu.memory_space<vmem>>, %arg5: memref<8x128xf32, #tpu.memory_space<vmem>>, %arg6: memref<1x8x128xf32, #tpu.memory_space<vmem>>) attributes {dimension_semantics = [#tpu.dimension_semantics<parallel>, #tpu.dimension_semantics<parallel>], iteration_bounds = array<i64: 2, 1>, scalar_prefetch = 0 : i64, scratch_operands = 0 : i64, tpu.core_type = #tpu.core_type<tc>, window_params = [{transform_indices = @transform_0, window_bounds = array<i64: 1, 16, 8>}, {pipeline_mode = #tpu.pipeline_mode<synchronous>, transform_indices = @transform_1, window_bounds = array<i64: 5, 8, 128>}, {pipeline_mode = #tpu.pipeline_mode<synchronous>, transform_indices = @transform_2, window_bounds = array<i64: 1, 128>}, {pipeline_mode = #tpu.pipeline_mode<synchronous>, transform_indices = @transform_3, window_bounds = array<i64: 8, 128>}, {transform_indices = @transform_4, window_bounds = array<i64: 1, 8, 128>}]} {
    %c8_i32 = arith.constant 8 : i32
    %0 = arith.muli %arg1, %c8_i32 : i32
    %1 = tpu.assume_multiple %0, 8 : i32
    %c0 = arith.constant 0 : index
    %2 = arith.index_cast %1 : i32 to index
    %c0_0 = arith.constant 0 : index
    %3 = vector.load %arg2[%c0, %2, %c0_0] : memref<1x16x8xf32, #tpu.memory_space<vmem>>, vector<1x16x8xf32>
    %4 = vector.shape_cast %3 : vector<1x16x8xf32> to vector<16x8xf32>
    %cst = arith.constant 0.000000e+00 : f32
    %5 = vector.broadcast %cst : f32 to vector<8x128xf32>
    %6 = vector.extract_strided_slice %4 {offsets = [0, 0], sizes = [8, 8], strides = [1, 1]} : vector<16x8xf32> to vector<8x8xf32>
    %c0_1 = arith.constant 0 : index
    %c0_2 = arith.constant 0 : index
    %c0_3 = arith.constant 0 : index
    %7 = vector.load %arg3[%c0_1, %c0_2, %c0_3] : memref<5x8x128xf32, #tpu.memory_space<vmem>>, vector<1x8x128xf32>
    %8 = vector.shape_cast %7 : vector<1x8x128xf32> to vector<8x128xf32>
    %cst_4 = arith.constant dense<0.000000e+00> : vector<8x128xf32>
    %9 = tpu.matmul %6, %8, %cst_4 {dimension_numbers = #tpu.dot_dimension_numbers<[1], [0], [0], [1], [0, 0, 1, 1], [], []>} : vector<8x8xf32>, vector<8x128xf32>, vector<8x128xf32> -> vector<8x128xf32>
    %10 = arith.addf %5, %9 : vector<8x128xf32>
    %11 = vector.extract_strided_slice %4 {offsets = [1, 0], sizes = [8, 8], strides = [1, 1]} : vector<16x8xf32> to vector<8x8xf32>
    %c1 = arith.constant 1 : index
    %c0_5 = arith.constant 0 : index
    %c0_6 = arith.constant 0 : index
    %12 = vector.load %arg3[%c1, %c0_5, %c0_6] : memref<5x8x128xf32, #tpu.memory_space<vmem>>, vector<1x8x128xf32>
    %13 = vector.shape_cast %12 : vector<1x8x128xf32> to vector<8x128xf32>
    %cst_7 = arith.constant dense<0.000000e+00> : vector<8x128xf32>
    %14 = tpu.matmul %11, %13, %cst_7 {dimension_numbers = #tpu.dot_dimension_numbers<[1], [0], [0], [1], [0, 0, 1, 1], [], []>} : vector<8x8xf32>, vector<8x128xf32>, vector<8x128xf32> -> vector<8x128xf32>
    %15 = arith.addf %10, %14 : vector<8x128xf32>
    %16 = vector.extract_strided_slice %4 {offsets = [2, 0], sizes = [8, 8], strides = [1, 1]} : vector<16x8xf32> to vector<8x8xf32>
    %c2 = arith.constant 2 : index
    %c0_8 = arith.constant 0 : index
    %c0_9 = arith.constant 0 : index
    %17 = vector.load %arg3[%c2, %c0_8, %c0_9] : memref<5x8x128xf32, #tpu.memory_space<vmem>>, vector<1x8x128xf32>
    %18 = vector.shape_cast %17 : vector<1x8x128xf32> to vector<8x128xf32>
    %cst_10 = arith.constant dense<0.000000e+00> : vector<8x128xf32>
    %19 = tpu.matmul %16, %18, %cst_10 {dimension_numbers = #tpu.dot_dimension_numbers<[1], [0], [0], [1], [0, 0, 1, 1], [], []>} : vector<8x8xf32>, vector<8x128xf32>, vector<8x128xf32> -> vector<8x128xf32>
    %20 = arith.addf %15, %19 : vector<8x128xf32>
    %21 = vector.extract_strided_slice %4 {offsets = [3, 0], sizes = [8, 8], strides = [1, 1]} : vector<16x8xf32> to vector<8x8xf32>
    %c3 = arith.constant 3 : index
    %c0_11 = arith.constant 0 : index
    %c0_12 = arith.constant 0 : index
    %22 = vector.load %arg3[%c3, %c0_11, %c0_12] : memref<5x8x128xf32, #tpu.memory_space<vmem>>, vector<1x8x128xf32>
    %23 = vector.shape_cast %22 : vector<1x8x128xf32> to vector<8x128xf32>
    %cst_13 = arith.constant dense<0.000000e+00> : vector<8x128xf32>
    %24 = tpu.matmul %21, %23, %cst_13 {dimension_numbers = #tpu.dot_dimension_numbers<[1], [0], [0], [1], [0, 0, 1, 1], [], []>} : vector<8x8xf32>, vector<8x128xf32>, vector<8x128xf32> -> vector<8x128xf32>
    %25 = arith.addf %20, %24 : vector<8x128xf32>
    %26 = vector.extract_strided_slice %4 {offsets = [4, 0], sizes = [8, 8], strides = [1, 1]} : vector<16x8xf32> to vector<8x8xf32>
    %c4 = arith.constant 4 : index
    %c0_14 = arith.constant 0 : index
    %c0_15 = arith.constant 0 : index
    %27 = vector.load %arg3[%c4, %c0_14, %c0_15] : memref<5x8x128xf32, #tpu.memory_space<vmem>>, vector<1x8x128xf32>
    %28 = vector.shape_cast %27 : vector<1x8x128xf32> to vector<8x128xf32>
    %cst_16 = arith.constant dense<0.000000e+00> : vector<8x128xf32>
    %29 = tpu.matmul %26, %28, %cst_16 {dimension_numbers = #tpu.dot_dimension_numbers<[1], [0], [0], [1], [0, 0, 1, 1], [], []>} : vector<8x8xf32>, vector<8x128xf32>, vector<8x128xf32> -> vector<8x128xf32>
    %30 = arith.addf %25, %29 : vector<8x128xf32>
    %c0_17 = arith.constant 0 : index
    %c0_18 = arith.constant 0 : index
    %31 = vector.load %arg4[%c0_17, %c0_18] : memref<1x128xf32, #tpu.memory_space<vmem>>, vector<1x128xf32>
    %32 = vector.broadcast %31 : vector<1x128xf32> to vector<8x128xf32>
    %33 = arith.addf %30, %32 : vector<8x128xf32>
    %cst_19 = arith.constant 0.000000e+00 : f32
    %34 = vector.broadcast %cst_19 : f32 to vector<8x128xf32>
    %35 = arith.maximumf %33, %34 : vector<8x128xf32>
    %36 = arith.index_cast %1 : i32 to index
    %c0_20 = arith.constant 0 : index
    %37 = vector.load %arg5[%36, %c0_20] : memref<8x128xf32, #tpu.memory_space<vmem>>, vector<8x128xf32>
    %38 = arith.addf %35, %37 : vector<8x128xf32>
    %c0_21 = arith.constant 0 : index
    %c0_22 = arith.constant 0 : index
    %c0_23 = arith.constant 0 : index
    %39 = vector.load %arg6[%c0_21, %c0_22, %c0_23] : memref<1x8x128xf32, #tpu.memory_space<vmem>>, vector<1x8x128xf32>
    %40 = vector.shape_cast %39 : vector<1x8x128xf32> to vector<8x128xf32>
    %41 = vector.shape_cast %38 : vector<8x128xf32> to vector<1x8x128xf32>
    tpu.vector_store %arg6[%c0_21, %c0_22, %c0_23], %41 {strides = array<i32>} : memref<1x8x128xf32, #tpu.memory_space<vmem>>, vector<1x8x128xf32>,
    return
  }
  func.func @transform_0(%arg0: i32, %arg1: i32) -> (i32, i32, i32) {
    %c0_i32 = arith.constant 0 : i32
    %c0_i32_0 = arith.constant 0 : i32
    %c0_i32_1 = arith.constant 0 : i32
    return %arg0, %c0_i32, %c0_i32_0 : i32, i32, i32
  }
  func.func @transform_1(%arg0: i32, %arg1: i32) -> (i32, i32, i32) {
    %c0_i32 = arith.constant 0 : i32
    %c0_i32_0 = arith.constant 0 : i32
    %c0_i32_1 = arith.constant 0 : i32
    %c0_i32_2 = arith.constant 0 : i32
    return %c0_i32, %c0_i32_0, %c0_i32_1 : i32, i32, i32
  }
  func.func @transform_2(%arg0: i32, %arg1: i32) -> (i32, i32) {
    %c0_i32 = arith.constant 0 : i32
    %c0_i32_0 = arith.constant 0 : i32
    %c0_i32_1 = arith.constant 0 : i32
    return %c0_i32, %c0_i32_0 : i32, i32
  }
  func.func @transform_3(%arg0: i32, %arg1: i32) -> (i32, i32) {
    %c0_i32 = arith.constant 0 : i32
    %c0_i32_0 = arith.constant 0 : i32
    %c0_i32_1 = arith.constant 0 : i32
    return %c0_i32, %c0_i32_0 : i32, i32
  }
  func.func @transform_4(%arg0: i32, %arg1: i32) -> (i32, i32, i32) {
    %c0_i32 = arith.constant 0 : i32
    %c0_i32_0 = arith.constant 0 : i32
    return %arg0, %arg1, %c0_i32 : i32, i32, i32
  }
}

</mosaic_0001>

<bundles_post_ra>
// kernel: tpu_custom_call.1
= control target key start
LH: loop header
LB: loop body
LE: loop exit
PB: predicated region body
PF: predicated region fallthrough
CT: control target
= control target key end

     0   :  { %9 = vsyncpa [#allocation3], 0  ;;  %s1071_s0 = inlined_call_operand.vmem [shape: f32[2,16,8], index: 0, kind: input, shape index: {}]   ;;  %s1072_s1 = inlined_call_operand.vmem [shape: f32[5,8,128], index: 1, kind: input, shape index: {}]   ;;  %s1073_s2 = inlined_call_operand.vmem [shape: f32[1,128], index: 2, kind: input, shape index: {}]   ;;  %s1074_s3 = inlined_call_operand.vmem [shape: f32[8,128], index: 3, kind: input, shape index: {}]   ;;  %s1075_s4 = inlined_call_operand.hbm [shape: f32[2,8,128], index: 4, kind: output, shape index: {}]  }
   0x1   :  { %11 = vsyncpa [#allocation3 + $0x1], 0  ;;  %s928_s15 = smov 0   ;;  %s930_s16 = smov 0  }
   0x2   :  { %s932_s17 = smov 0   ;;  %s934_s18 = smov 0  }
   0x3   :  { %s936_s19 = smov 0   ;;  %s938_s20 = smov 0  }
   0x4 LB: > { %s705_s21 = sadd.s32 4294967295, %s898_s20   ;;  %s706_s22 = sadd.s32 4294967294, %s898_s20   ;;  %s898_s20 = sphi %s938_s20, %s17_s20   ;;  %s894_s19 = sphi %s936_s19, %s1082_s19   ;;  %s890_s18 = sphi %s934_s18, %s1081_s18   ;;  %s886_s17 = sphi %s932_s17, %s1080_s17   ;;  %s882_s16 = sphi %s930_s16, %s1079_s16   ;;  %s878_s15 = sphi %s928_s15, %s1078_s15  }
   0x5   : > { %s29_s23 = sadd.s32 1, %s894_s19  ;;  %s127_s24 = sadd.s32 1, %s886_s17 }
   0x6   : > { %p31_p0 = scmp.ge.s32.totalorder %s29_s23, 2  ;;  %p137_p1 = scmp.ne.s32.totalorder %s886_s17, %s882_s16 }
   0x7   : > { %p138_p2 = scmp.eq.s32.totalorder %s705_s21, 1  ;;  %p143_p3 = scmp.ne.s32.totalorder %s882_s16, %s878_s15 }
   0x8   : > { %s1084_s23 = smov (%p31_p0, %s29_s23), 0  ;;  %p144_p5 = scmp.eq.s32.totalorder %s706_s22, 1 }
   0x9   : > { %p968_p4 = por %p138_p2, %p137_p1  ;;  %s122_s26 = ssub.s32 %s894_s19, %s1084_s23 }
   0xa   : > { %p709_p6 = scmp.ge.s32.totalorder %s898_s20, 1  ;;  %p125_p7 = scmp.eq.s32.totalorder %s122_s26, 0 }
   0xb   : > { %p975_p8 = por %p144_p5, %p143_p3  ;;  %p179_p9 = scmp.lt.s32.totalorder %s898_s20, 3 }
   0xc   : > { %s981_s28 = scalar_select %p125_p7, %s886_s17, %s127_s24  }
   0xd   : > { %p180_p10 = pnand %p709_p6, %p179_p9 }
   0xe   : > { %v713_v0 = vld [vmem:[%s1072_s1 + $0x8] sm:$0xff] (!%p180_p10)  ;;  %v214_v1 = vld [vmem:[%s1072_s1] sm:$0xff] (!%p180_p10)  ;;  %p205_p11 = scmp.lt.s32.totalorder (!%p180_p10), %s890_s18, 1  ;;  %v900_v2 = vmov (!%p180_p10), 0.0   ;;  %vm901_vm0 = vmmov (!%p180_p10), 0   ;;  %vm223_vm1 = vcmask (!%p180_p10), 64512  }
   0xf   : > { %183 = sbr.rel (%p180_p10) target bundleno = 272 (0x110), region = 36  ;;  %738 = vmatprep.subr.mxu0 (!%p180_p10), %v900_v2  ;;  %743 = vmatprep.subr.mxu1 (!%p180_p10), %v900_v2  ;;  %v718_v3 = vld [vmem:[%s1072_s1 + $0x18] sm:$0xff] (!%p180_p10)  ;;  %vm219_vm2 = vcmask (!%p180_p10), 1046528   ;;  %vm449_vm3 = vcmask (!%p180_p10), 1044480   ;;  %v716_v10 = vld [vmem:[%s1072_s1 + $0x10] sm:$0xff] (!%p180_p10)  ;;  %vm370_vm4 = vcmask (!%p180_p10), 1045504  }
  0x10   : > { %739 = vmatpush3.msra.mxu0 (!%p180_p10), %v713_v0  ;;  %740 = vmatprep.mubr.msk.f32.mxu0 (!%p180_p10), %vm901_vm0, %v900_v2  ;;  %v720_v18 = vld [vmem:[%s1072_s1 + $0x20] sm:$0xff] (!%p180_p10)  ;;  %vm528_vm5 = vcmask (!%p180_p10), 1043456   ;;  %s202_s26 = sand.u32 (!%p180_p10), 1, %s882_s16  }
  0x11   : > { %744 = vmatpush3.msra.mxu1 (!%p180_p10), %v214_v1  ;;  %745 = vmatprep.mubr.msk.f32.mxu1 (!%p180_p10), %vm901_vm0, %v900_v2  ;;  %s710_s29 = sshll.u32 (!%p180_p10), %s202_s26, 3  ;;  %v722_v32 = vld [vmem:[%s1073_s2] ss:$0 sm:$0xff] (!%p180_p10)  ;;  %s619_s14 = scalar_lea.sflag (!%p180_p10), [#allocation3], %s202_s26 }
  0x12   : > { %748 = vmatprep.subr.mxu0 (!%p180_p10), %v900_v2  ;;  %753 = vmatprep.subr.mxu1 (!%p180_p10), %v900_v2  ;;  %v615_v36 = vld [vmem:[%s1074_s3] sm:$0xff] (!%p180_p10)  ;;  %s204_s9 = scalar_lea.vmem (!%p180_p10), [#allocation2], %s710_s29 }
  0x13   : > { %s633_s10 = sshll.u32 (!%p180_p10), %s204_s9, 4  ;;  %s1026_s10 = int_to_ptr.vmem [resolvable:$true] %s633_s10 }
  0x14   : > { %s820_s21 = scalar_lea.vmem (!%p180_p10), %s1026_s10, 128 }
  0x15   : > { %p821_p12 = scmp.ne.s32.totalorder (!%p180_p10), %s1026_s10, %s820_s21 }
  0x16   : > { %s206_s7 = scalar_select %p205_p11, %s890_s18, 1 }
  0x17   : > { %p822_p13 = pnand %p821_p12, %p968_p4 }
  0x18   : > { %s727_s8 = sshll.u32 %s206_s7, 4 }
  0x19   : > { %s209_s11 = scalar_lea.vmem %s1071_s0, %s727_s8  ;;  %s724_s8 = sshll.u32 %s890_s18, 7 }
  0x1a   : > { %v212_v4 = vld [vmem:[%s209_s11] sm:$0xff]  ;;  %v213_v5 = vld [vmem:[%s209_s11 + $0x8] sm:$0xff]  ;;  %s1024_s13 = scalar_lea.hbm %s1075_s4, %s724_s8  ;;  %p823_p0 = pneg %p822_p13 }
  0x1b   : > { %v220_v6 = vrot.slane %v212_v4, 1  ;;  %v221_v7 = vrot.slane %v213_v5, 1  ;;  %746 = vmatmul.mubr.msk.f32.vlgmr.msra.gmra.mrb[0].mxu1 %vm223_vm1, %v212_v4  ;;  %v371_v8 = vrot.slane %v212_v4, 2  ;;  %v372_v9 = vrot.slane %v213_v5, 2  ;;  %s902_s18 = smov [#allocation2]  }
  0x1c   : > { %754 = vmatpush3.msra.mxu1 %v718_v3  ;;  %755 = vmatprep.mubr.msk.f32.mxu1 %vm901_vm0, %v900_v2  ;;  %v450_v11 = vrot.slane %v212_v4, 3  ;;  %v451_v12 = vrot.slane %v213_v5, 3  ;;  %v529_v16 = vrot.slane %v212_v4, 4  ;;  %v530_v17 = vrot.slane %v213_v5, 4  ;;  %s824_s22 = sshll.u32 %s902_s18, 4  ;;  %s825_s22 = int_to_ptr.vmem [resolvable:$false] %s824_s22 }
  0x1d   : > { %v222_v13 = vsel %vm219_vm2, %v220_v6, %v221_v7  ;;  %v373_v15 = vsel %vm370_vm4, %v371_v8, %v372_v9  ;;  %s826_s24 = scalar_lea.vmem %s825_s22, 256  ;;  %p827_p1 = scmp.lt.s32.totalorder %s1026_s10, %s825_s22 }
  0x1e   : > { %741 = vmatmul.mubr.msk.f32.vlgmr.msra.gmra.mrb[0].mxu0 %vm223_vm1, %v222_v13  ;;  %v452_v14 = vsel %vm449_vm3, %v450_v11, %v451_v12  ;;  %v531_v19 = vsel %vm528_vm5, %v529_v16, %v530_v17  ;;  %p828_p2 = scmp.lt.s32.totalorder %s826_s24, %s820_s21 }
  0x1f   : > { %749 = vmatpush3.msra.mxu0 %v716_v10  ;;  %750 = vmatprep.mubr.msk.f32.mxu0 %vm901_vm0, %v900_v2 }
  0x20   : > { %758 = vmatprep.subr.mxu0 %v900_v2  ;;  %756 = vmatmul.mubr.msk.f32.vlgmr.msra.gmra.mrb[2].mxu1 %vm223_vm1, %v452_v14  ;;  %p829_p3 = por %p828_p2, %p827_p1 }
  0x22   : > { %751 = vmatmul.mubr.msk.f32.vlgmr.msra.gmra.mrb[2].mxu0 %vm223_vm1, %v373_v15  ;;  %p830_p5 = pnand %p829_p3, %p823_p0 }
  0x23   : > { %759 = vmatpush3.msra.mxu0 %v720_v18  ;;  %760 = vmatprep.mubr.msk.f32.mxu0 %vm901_vm0, %v900_v2 }
  0x26   : > { %761 = vmatmul.mubr.msk.f32.vlgmr.msra.gmra.mrb[4].mxu0 %vm223_vm1, %v531_v19 }
  0xee   : > { %v364_v20 = vpop.f32.mrb[0].mxu1 }
  0xef   : > { %v747_v21 = vpop.f32.mrb[1].mxu1 }
  0xf1   : > { %v292_v22 = vpop.f32.mrb[0].mxu0 }
  0xf2   : > { %v365_v23 = vadd.f32 %v364_v20, %v292_v22  ;;  %v742_v24 = vpop.f32.mrb[1].mxu0 }
  0xf3   : > { %v521_v25 = vpop.f32.mrb[2].mxu1 }
  0xf4   : > { %v757_v26 = vpop.f32.mrb[3].mxu1 }
  0xf5   : > { %v442_v27 = vpop.f32.mrb[2].mxu0 }
  0xf6   : > { %v446_v28 = vadd.f32 %v442_v27, %v365_v23  ;;  %v752_v29 = vpop.f32.mrb[3].mxu0 }
  0xf8   : > { %v525_v30 = vadd.f32 %v521_v25, %v446_v28 }
  0xf9   : > { %v600_v31 = vpop.f32.mrb[4].mxu0 }
  0xfa   : > { %v604_v33 = vadd.f32 %v600_v31, %v525_v30  ;;  %v762_v34 = vpop.f32.mrb[5].mxu0 }
  0xfc   : > { %v612_v35 = vadd.f32 %v722_v32, %v604_v33 }
  0xfe   : > { %v613_v37 = vmax.f32 %v612_v35, 0.0 }
 0x100   : > { %v616_v38 = vadd.f32 %v615_v36, %v613_v37 }
 0x102   : > { %617 = vst [vmem:[%s204_s9] sm:$0xff] %v616_v38 }
 0x103   : > { %833 = shalt.err (!%p830_p5)
}
 0x104   : > { %s834_s26 = scalar_lea.hbm %s1024_s13, 128  ;;  %s838_s5 = scalar_lea.hbm %s1075_s4, 256 }
 0x105   : > { %p835_p6 = scmp.ne.s32.totalorder %s1024_s13, %s834_s26  ;;  %p839_p10 = scmp.lt.u32.totalorder %s1024_s13, %s1075_s4 }
 0x106   : > { %p840_p11 = scmp.lt.u32.totalorder %s838_s5, %s834_s26  ;;  %p842_p13 = scmp.lt.u32.totalorder %s834_s26, %s1024_s13 }
 0x107   : > { %p836_p7 = pnand %p835_p6, %p968_p4 }
 0x108   : > { %p841_p12 = por %p840_p11, %p839_p10 }
 0x109   : > { %p837_p9 = pneg %p836_p7 }
 0x10a   : > { %p843_p0 = por %p842_p13, %p841_p12 }
 0x10c   : > { %p844_p1 = pnand %p843_p0, %p837_p9 }
 0x10e   : > { %847 = shalt.err (!%p844_p1)
}
 0x10f   : > { %763 = dma.vmem_to_hbm [thread:$0]  (%p968_p4), %s1026_s10, 128, %s1024_s13, %s619_s14  }
 0x110 PF: > { %p769_p2 = scmp.ge.s32.totalorder %s898_s20, 2  ;;  %s645_s8 = sand.u32 1, %s878_s15  }
 0x111   : > { %s646_s9 = scalar_lea.sflag [#allocation3], %s645_s8 }
 0x112   : > { %p766_p3 = pnand %p769_p2, %p975_p8 }
 0x114   : > { %873 = dma.done.wait (!%p766_p3), %s646_s9, 128  }
 0x115   : > { %875 = vsyncadd (!%p766_p3), %s646_s9, 4294967168  ;;  %s17_s20 = sadd.s32 1, %s898_s20   ;;  %s1078_s15 = smov %s882_s16 }
 0x116   : > { %p14_p5 = scmp.ge.s32.totalorder %s17_s20, 4   ;;  %s1079_s16 = smov %s886_s17 }
 0x117   : > { %s1080_s17 = smov %s981_s28  ;;  %s1081_s18 = smov %s894_s19 }
 0x118   : > { %s1082_s19 = smov %s1084_s23  ;;  %16 = sbr.rel (!%p14_p5) target bundleno = 4 (0x4), region = 77 }
 0x11f   :  { %651 = vsyncpa [#allocation3], 1 }
 0x120   :  { %653 = vsyncpa [#allocation3 + $0x1], 1 }

</bundles_post_ra>
